<compile_context>
chip_gen: v6e
topology: v6e:2x2x1
jax: 0.10.0
libtpu: 0.0.40
codegen_flags: <defaults>
</compile_context>

<pallas_src>
import functools

import jax
import jax.numpy as jnp
from jax.experimental import pallas as pl
from jax.experimental.pallas import tpu as pltpu

LANE = 128
SUBLANE = 8
VMEM_BUDGET_BYTES = 32 * 1024 * 1024  # conservative (default scoped limit)


def _round_up(x, m):
    return (x + m - 1) // m * m


def _mlp_kernel(x_ref, w_ref, b_ref, o_ref, *, num_layers):
    """Fused (Linear -> ReLU) x num_layers on one (tm, P) activation tile.

    x_ref: (tm, P)    compute dtype (bf16)
    w_ref: (L, P, P)  compute dtype, layer-stacked, already (in, out) + zero padded
    b_ref: (L, 1, P)  float32
    o_ref: (tm, P)    float32
    """
    h = x_ref[...]
    acc = None
    for l in range(num_layers):                 # static, unrolled layer loop
        acc = jnp.dot(h, w_ref[l], preferred_element_type=jnp.float32)  # MXU, f32 acc
        acc = jnp.maximum(acc + b_ref[l], 0.0)  # bias + ReLU epilogue in f32 (VPU)
        h = acc.astype(x_ref.dtype)             # back to compute dtype for next MXU pass
    o_ref[...] = acc.astype(o_ref.dtype)        # final write from the f32 accumulator


def init_dnn_params(key, hidden_units):
    """Deterministic init matching nn.Linear shapes: weight (out,in), bias (out,)."""
    params = []
    for fan_in, fan_out in zip(hidden_units[:-1], hidden_units[1:]):
        key, kw, kb = jax.random.split(key, 3)
        bound = 1.0 / jnp.sqrt(jnp.float32(fan_in))
        w = jax.random.uniform(kw, (fan_out, fan_in), jnp.float32, -bound, bound)
        b = jax.random.uniform(kb, (fan_out,), jnp.float32, -bound, bound)
        params.append((w, b))
    return params


def prepare_dnn_params(params, *, compute_dtype=jnp.bfloat16):
    """One-time packing: transpose to (in,out), pad to lane-dense P, layer-stack.

    Zero padding is correctness-preserving: padded activation columns start at 0,
    padded weight rows/cols and bias entries are 0, and ReLU(0) = 0, so padded
    lanes stay 0 through every layer.
    """
    dims = [params[0][0].shape[1]] + [w.shape[0] for w, _ in params]
    P = _round_up(max(dims), LANE)
    L = len(params)
    w_packed = jnp.zeros((L, P, P), compute_dtype)
    b_packed = jnp.zeros((L, 1, P), jnp.float32)
    for l, (w, b) in enumerate(params):
        fan_out, fan_in = w.shape
        w_packed = w_packed.at[l, :fan_in, :fan_out].set(w.T.astype(compute_dtype))
        b_packed = b_packed.at[l, 0, :fan_out].set(b.astype(jnp.float32))
    return w_packed, b_packed, dims[0], dims[-1], P


@functools.partial(jax.jit, static_argnames=("out_dim", "tm"))
def dnn_forward(x, w_packed, b_packed, *, out_dim, tm=256):
    """Mirror of DNN.forward (eval mode: dropout is identity).

    x: (M, K) f32.  w_packed: (L, P, P) compute dtype.  b_packed: (L, 1, P) f32.
    """
    M, K = x.shape
    L, P, P2 = w_packed.shape
    assert P == P2 and K <= P and out_dim <= P
    compute_dtype = w_packed.dtype
    itemsize = jnp.dtype(compute_dtype).itemsize

    # Batch tile: sublane-aligned for the compute dtype (8 f32 / 16 bf16), <= padded M.
    sub = SUBLANE * (4 // itemsize)
    tm = max(sub, _round_up(min(tm, M), sub))
    M_pad = _round_up(M, tm)

    # VMEM footprint: double-buffered in/out activation tiles + resident weights.
    vmem_bytes = (2 * tm * P * itemsize            # input tile (double buffered)
                  + L * P * P * itemsize           # packed weights (resident)
                  + L * P * 4                      # biases (f32)
                  + 2 * tm * P * 4)                # f32 output tile (double buffered)
    assert vmem_bytes < VMEM_BUDGET_BYTES, (
        f"fused-MLP VMEM footprint {vmem_bytes / 2**20:.1f} MiB exceeds budget; "
        "split layers across pallas_calls or tile the feature dim")

    # Pad activations: zero rows (batch) and zero feature lanes.
    x_pad = jnp.zeros((M_pad, P), compute_dtype)
    x_pad = x_pad.at[:M, :K].set(x.astype(compute_dtype))

    out = pl.pallas_call(
        functools.partial(_mlp_kernel, num_layers=L),
        out_shape=jax.ShapeDtypeStruct((M_pad, P), jnp.float32),
        grid_spec=pltpu.PrefetchScalarGridSpec(
            num_scalar_prefetch=0,
            grid=(M_pad // tm,),
            in_specs=[
                pl.BlockSpec((tm, P), lambda i: (i, 0)),        # activation tile
                pl.BlockSpec((L, P, P), lambda i: (0, 0, 0)),   # weights: resident
                pl.BlockSpec((L, 1, P), lambda i: (0, 0, 0)),   # biases: resident
            ],
            out_specs=pl.BlockSpec((tm, P), lambda i: (i, 0)),
        ),
        compiler_params=pltpu.CompilerParams(
            dimension_semantics=("parallel",),
        ),
    )(x_pad, w_packed, b_packed)

    # self.dropout(x): identity at inference time.
    return out[:M, :out_dim]


def dnn_reference(x, params, compute_dtype=jnp.float32):
    """Pure-JAX reference mirroring the kernel numerics (optionally bf16 matmuls)."""
    h = x
    for w, b in params:
        acc = jnp.dot(h.astype(compute_dtype), w.T.astype(compute_dtype),
                      preferred_element_type=jnp.float32)
        h = jnp.maximum(acc + b.astype(jnp.float32), 0.0)
    return h


if __name__ == "__main__":
    key = jax.random.PRNGKey(0)

    hidden_units = [32, 64, 32]          # input dim 32 -> 64 -> 32
    batch = 8

    key, kx = jax.random.split(key)
    x = jax.random.normal(kx, (batch, hidden_units[0]), jnp.float32)

    params = init_dnn_params(key, hidden_units)
    w_packed, b_packed, in_dim, out_dim, P = prepare_dnn_params(
        params, compute_dtype=jnp.bfloat16)

    out = dnn_forward(x, w_packed, b_packed, out_dim=out_dim)
    out = jax.block_until_ready(out)

    assert out.shape == (batch, hidden_units[-1])
    assert bool(jnp.all(jnp.isfinite(out)))

    # Check vs a reference with identical numerics (bf16 matmul, f32 accumulate).
    ref_bf16 = dnn_reference(x, params, compute_dtype=jnp.bfloat16)
    assert jnp.allclose(out, ref_bf16, atol=5e-3, rtol=5e-3), "mismatch vs bf16 reference"

    # Loose check vs pure-f32 reference (bf16 MXU feed costs <~1% relative error).
    ref_f32 = dnn_reference(x, params, compute_dtype=jnp.float32)
    assert jnp.allclose(out, ref_f32, atol=5e-2, rtol=5e-2), "mismatch vs f32 reference"

    print("KERNEL_OK")
</pallas_src>

<mosaic_0001>
module attributes {stable_mosaic.version = 11 : i64} {
  func.func @_mlp_kernel(%arg0: i32, %arg1: memref<16x128xbf16, #tpu.memory_space<vmem>>, %arg2: memref<2x128x128xbf16, #tpu.memory_space<vmem>>, %arg3: memref<2x1x128xf32, #tpu.memory_space<vmem>>, %arg4: memref<16x128xf32, #tpu.memory_space<vmem>>) attributes {dimension_semantics = [#tpu.dimension_semantics<parallel>], iteration_bounds = array<i64: 1>, scalar_prefetch = 0 : i64, scratch_operands = 0 : i64, tpu.core_type = #tpu.core_type<tc>, window_params = [{transform_indices = @transform_0, window_bounds = array<i64: 16, 128>}, {pipeline_mode = #tpu.pipeline_mode<synchronous>, transform_indices = @transform_1, window_bounds = array<i64: 2, 128, 128>}, {pipeline_mode = #tpu.pipeline_mode<synchronous>, transform_indices = @transform_2, window_bounds = array<i64: 2, 1, 128>}, {transform_indices = @transform_3, window_bounds = array<i64: 16, 128>}]} {
    %c0 = arith.constant 0 : index
    %c0_0 = arith.constant 0 : index
    %0 = vector.load %arg1[%c0, %c0_0] : memref<16x128xbf16, #tpu.memory_space<vmem>>, vector<16x128xbf16>
    %c0_1 = arith.constant 0 : index
    %c0_2 = arith.constant 0 : index
    %c0_3 = arith.constant 0 : index
    %1 = vector.load %arg2[%c0_1, %c0_2, %c0_3] : memref<2x128x128xbf16, #tpu.memory_space<vmem>>, vector<1x128x128xbf16>
    %2 = vector.shape_cast %1 : vector<1x128x128xbf16> to vector<128x128xbf16>
    %cst = arith.constant dense<0.000000e+00> : vector<16x128xf32>
    %3 = tpu.matmul %0, %2, %cst {dimension_numbers = #tpu.dot_dimension_numbers<[1], [0], [0], [1], [0, 0, 1, 1], [], []>} : vector<16x128xbf16>, vector<128x128xbf16>, vector<16x128xf32> -> vector<16x128xf32>
    %c0_4 = arith.constant 0 : index
    %c0_5 = arith.constant 0 : index
    %c0_6 = arith.constant 0 : index
    %4 = vector.load %arg3[%c0_4, %c0_5, %c0_6] : memref<2x1x128xf32, #tpu.memory_space<vmem>>, vector<1x1x128xf32>
    %5 = vector.shape_cast %4 : vector<1x1x128xf32> to vector<1x128xf32>
    %6 = vector.broadcast %5 : vector<1x128xf32> to vector<16x128xf32>
    %7 = arith.addf %3, %6 : vector<16x128xf32>
    %cst_7 = arith.constant 0.000000e+00 : f32
    %8 = vector.broadcast %cst_7 : f32 to vector<16x128xf32>
    %9 = arith.maximumf %7, %8 : vector<16x128xf32>
    %10 = arith.truncf %9 : vector<16x128xf32> to vector<16x128xbf16>
    %c1 = arith.constant 1 : index
    %c0_8 = arith.constant 0 : index
    %c0_9 = arith.constant 0 : index
    %11 = vector.load %arg2[%c1, %c0_8, %c0_9] : memref<2x128x128xbf16, #tpu.memory_space<vmem>>, vector<1x128x128xbf16>
    %12 = vector.shape_cast %11 : vector<1x128x128xbf16> to vector<128x128xbf16>
    %cst_10 = arith.constant dense<0.000000e+00> : vector<16x128xf32>
    %13 = tpu.matmul %10, %12, %cst_10 {dimension_numbers = #tpu.dot_dimension_numbers<[1], [0], [0], [1], [0, 0, 1, 1], [], []>} : vector<16x128xbf16>, vector<128x128xbf16>, vector<16x128xf32> -> vector<16x128xf32>
    %c1_11 = arith.constant 1 : index
    %c0_12 = arith.constant 0 : index
    %c0_13 = arith.constant 0 : index
    %14 = vector.load %arg3[%c1_11, %c0_12, %c0_13] : memref<2x1x128xf32, #tpu.memory_space<vmem>>, vector<1x1x128xf32>
    %15 = vector.shape_cast %14 : vector<1x1x128xf32> to vector<1x128xf32>
    %16 = vector.broadcast %15 : vector<1x128xf32> to vector<16x128xf32>
    %17 = arith.addf %13, %16 : vector<16x128xf32>
    %cst_14 = arith.constant 0.000000e+00 : f32
    %18 = vector.broadcast %cst_14 : f32 to vector<16x128xf32>
    %19 = arith.maximumf %17, %18 : vector<16x128xf32>
    %c0_15 = arith.constant 0 : index
    %c0_16 = arith.constant 0 : index
    %20 = vector.load %arg4[%c0_15, %c0_16] : memref<16x128xf32, #tpu.memory_space<vmem>>, vector<16x128xf32>
    tpu.vector_store %arg4[%c0_15, %c0_16], %19 {strides = array<i32>} : memref<16x128xf32, #tpu.memory_space<vmem>>, vector<16x128xf32>,
    return
  }
  func.func @transform_0(%arg0: i32) -> (i32, i32) {
    %c0_i32 = arith.constant 0 : i32
    %c0_i32_0 = arith.constant 0 : i32
    return %arg0, %c0_i32 : i32, i32
  }
  func.func @transform_1(%arg0: i32) -> (i32, i32, i32) {
    %c0_i32 = arith.constant 0 : i32
    %c0_i32_0 = arith.constant 0 : i32
    %c0_i32_1 = arith.constant 0 : i32
    %c0_i32_2 = arith.constant 0 : i32
    return %c0_i32, %c0_i32_0, %c0_i32_1 : i32, i32, i32
  }
  func.func @transform_2(%arg0: i32) -> (i32, i32, i32) {
    %c0_i32 = arith.constant 0 : i32
    %c0_i32_0 = arith.constant 0 : i32
    %c0_i32_1 = arith.constant 0 : i32
    %c0_i32_2 = arith.constant 0 : i32
    return %c0_i32, %c0_i32_0, %c0_i32_1 : i32, i32, i32
  }
  func.func @transform_3(%arg0: i32) -> (i32, i32) {
    %c0_i32 = arith.constant 0 : i32
    %c0_i32_0 = arith.constant 0 : i32
    return %arg0, %c0_i32 : i32, i32
  }
}

</mosaic_0001>

<bundles_post_ra>
// kernel: dnn_forward.1
= control target key start
LH: loop header
LB: loop body
LE: loop exit
PB: predicated region body
PF: predicated region fallthrough
CT: control target
= control target key end

     0   :  { %8 = vsyncpa [#allocation3], 0  ;;  %s397_s12 = smov [#allocation2]   ;;  %s440_s0 = inlined_call_operand.vmem [shape: bf16[16,128], index: 0, kind: input, shape index: {}]   ;;  %s441_s1 = inlined_call_operand.hbm [shape: bf16[2,128,128], index: 1, kind: input, shape index: {}]   ;;  %s442_s2 = inlined_call_operand.vmem [shape: f32[2,1,128], index: 2, kind: input, shape index: {}]   ;;  %s443_s3 = inlined_call_operand.vmem [shape: f32[16,128], index: 3, kind: output, shape index: {}]  }
   0x1   :  { %s16_s13 = sshll.u32 %s397_s12, 4  ;;  %s17_s13 = int_to_ptr.vmem [resolvable:$true] %s16_s13 }
   0x2   :  { %s383_s14 = scalar_lea.vmem %s17_s13, 2048  ;;  %p388_p1 = scmp.lt.s32.totalorder %s17_s13, %s17_s13 }
   0x3   :  { %p384_p0 = scmp.ne.s32.totalorder %s17_s13, %s383_s14  ;;  %p389_p2 = scmp.lt.s32.totalorder %s383_s14, %s383_s14 }
   0x5   :  { %p390_p3 = por %p389_p2, %p388_p1 }
   0x7   :  { %p391_p4 = pnand %p390_p3, %p384_p0 }
   0x9   :  { %394 = shalt.err (!%p391_p4)
}
   0xa   :  { %s398_s15 = smov 64   ;;  %s399_s16 = smov 4  }
   0xb   :  { %22 = dma.hbm_to_vmem [thread:$0]  %s441_s1, 2048, %s17_s13, [#allocation3], %s398_s15, %s398_s15, %s399_s16  }
   0xc   :  { %395 = dma.done.wait [#allocation3], 2048  }
   0xd   :  { %396 = vsyncadd [#allocation3], 4294965248  ;;  %v400_v0 = vmov 0.0   ;;  %vm401_vm0 = vmmov 0   ;;  %v358_v1 = vld [vmem:[#allocation2 + $0x38] sm:$0xff]   ;;  %v359_v2 = vld [vmem:[#allocation2 + $0x30] sm:$0xff]  }
   0xe   :  { %313 = vmatprep.subr.bf16.mxu0 %v400_v0  ;;  %329 = vmatprep.mubr.msk.bf16.mxu0 %vm401_vm0, %v400_v0  ;;  %v360_v3 = vld [vmem:[#allocation2 + $0x28] sm:$0xff]   ;;  %v367_v4 = vld [vmem:[#allocation2 + $0x78] sm:$0xff]   ;;  %v361_v5 = vld [vmem:[#allocation2 + $0x20] sm:$0xff]  }
   0xf   :  { %333 = vmatprep.subr.bf16.mxu1 %v400_v0  ;;  %349 = vmatprep.mubr.msk.bf16.mxu1 %vm401_vm0, %v400_v0  ;;  %v368_v6 = vld [vmem:[#allocation2 + $0x70] sm:$0xff]   ;;  %v362_v7 = vld [vmem:[#allocation2 + $0x18] sm:$0xff]   ;;  %v369_v8 = vld [vmem:[#allocation2 + $0x68] sm:$0xff]  }
  0x10   :  { %314 = vmatpush3.bf16.msra.mxu0 %v358_v1  ;;  %334 = vmatpush3.bf16.msra.mxu1 %v367_v4  ;;  %v363_v9 = vld [vmem:[#allocation2 + $0x10] sm:$0xff]   ;;  %v370_v10 = vld [vmem:[#allocation2 + $0x60] sm:$0xff]   ;;  %v364_v11 = vld [vmem:[#allocation2 + $0x8] sm:$0xff]  }
  0x11   :  { %315 = vmatprep.subr.bf16.mxu0 %v400_v0  ;;  %335 = vmatprep.subr.bf16.mxu1 %v400_v0  ;;  %v371_v12 = vld [vmem:[#allocation2 + $0x58] sm:$0xff]   ;;  %v365_v13 = vld [vmem:[#allocation2] sm:$0xff]   ;;  %v372_v15 = vld [vmem:[#allocation2 + $0x50] sm:$0xff]  }
  0x12   :  { %v366_v14 = vld [vmem:[%s440_s0] sm:$0xff]   ;;  %v373_v16 = vld [vmem:[#allocation2 + $0x48] sm:$0xff]  }
  0x13   :  { %v374_v17 = vld [vmem:[#allocation2 + $0x40] sm:$0xff]  }
  0x14   :  { %316 = vmatpush3.bf16.msra.mxu0 %v359_v2  ;;  %336 = vmatpush3.bf16.msra.mxu1 %v368_v6  ;;  %v275_v18 = vld [vmem:[%s442_s2] ss:$0 sm:$0xff]  ;;  %v286_v28 = vld [vmem:[%s442_s2 + $0x1] ss:$0 sm:$0xff] }
  0x15   :  { %317 = vmatprep.subr.bf16.mxu0 %v400_v0  ;;  %337 = vmatprep.subr.bf16.mxu1 %v400_v0 }
  0x18   :  { %318 = vmatpush3.bf16.msra.mxu0 %v360_v3  ;;  %338 = vmatpush3.bf16.msra.mxu1 %v369_v8 }
  0x19   :  { %319 = vmatprep.subr.bf16.mxu0 %v400_v0  ;;  %339 = vmatprep.subr.bf16.mxu1 %v400_v0 }
  0x1c   :  { %320 = vmatpush3.bf16.msra.mxu0 %v361_v5  ;;  %340 = vmatpush3.bf16.msra.mxu1 %v370_v10 }
  0x1d   :  { %321 = vmatprep.subr.bf16.mxu0 %v400_v0  ;;  %341 = vmatprep.subr.bf16.mxu1 %v400_v0 }
  0x20   :  { %322 = vmatpush3.bf16.msra.mxu0 %v362_v7  ;;  %342 = vmatpush3.bf16.msra.mxu1 %v371_v12 }
  0x21   :  { %323 = vmatprep.subr.bf16.mxu0 %v400_v0  ;;  %343 = vmatprep.subr.bf16.mxu1 %v400_v0 }
  0x24   :  { %324 = vmatpush3.bf16.msra.mxu0 %v363_v9  ;;  %344 = vmatpush3.bf16.msra.mxu1 %v372_v15 }
  0x25   :  { %325 = vmatprep.subr.bf16.mxu0 %v400_v0  ;;  %345 = vmatprep.subr.bf16.mxu1 %v400_v0 }
  0x28   :  { %326 = vmatpush3.bf16.msra.mxu0 %v364_v11  ;;  %346 = vmatpush3.bf16.msra.mxu1 %v373_v16 }
  0x29   :  { %327 = vmatprep.subr.bf16.mxu0 %v400_v0  ;;  %347 = vmatprep.subr.bf16.mxu1 %v400_v0 }
  0x2c   :  { %328 = vmatpush3.bf16.msra.mxu0 %v365_v13  ;;  %348 = vmatpush3.bf16.msra.mxu1 %v374_v17 }
  0x2f   :  { %330 = vmatmul.mubr.bf16.vlgmr.msra.gmra.mxu0 %v366_v14 }
  0xef   :  { %v142_v19 = vpop.f32.mrf.mxu0 }
  0xf0   :  { %v143_v21 = vadd.f32 %v275_v18, %v142_v19 }
  0xf1   :  { %v331_v20 = vpop.f32.mrf.mxu0 }
  0xf2   :  { %v149_v25 = vmax.f32 %v143_v21, 0.0 }
  0xf3   :  { %v145_v22 = vpop.f32.mrf.mxu0 }
  0xf4   :  { %v146_v23 = vadd.f32 %v275_v18, %v145_v22 }
  0xf5   :  { %v332_v24 = vpop.f32.mrf.mxu0 }
  0xf6   :  { %v150_v26 = vmax.f32 %v146_v23, 0.0 }
  0xf8   :  { %v151_v27 = vpack.c.bf16 %v150_v26, %v149_v25 }
  0xfa   :  { %350 = vmatmul.mubr.bf16.vlgmr.msra.gmra.mxu1 %v151_v27 }
 0x1ba   :  { %v259_v29 = vpop.f32.mrf.mxu1 }
 0x1bb   :  { %v260_v30 = vadd.f32 %v286_v28, %v259_v29 }
 0x1bc   :  { %v351_v31 = vpop.f32.mrf.mxu1 }
 0x1bd   :  { %v266_v32 = vmax.f32 %v260_v30, 0.0 }
 0x1be   :  { %v262_v33 = vpop.f32.mrf.mxu1 }
 0x1bf   :  { %268 = vst [vmem:[%s443_s3] sm:$0xff] %v266_v32  ;;  %v263_v34 = vadd.f32 %v286_v28, %v262_v33 }
 0x1c0   :  { %v352_v35 = vpop.f32.mrf.mxu1 }
 0x1c1   :  { %v267_v36 = vmax.f32 %v263_v34, 0.0 }
 0x1c3   :  { %269 = vst [vmem:[%s443_s3 + $0x8] sm:$0xff] %v267_v36 }
 0x1c4   :  { %274 = vsyncpa [#allocation3], 1 }

</bundles_post_ra>
